<compile_context>
chip_gen: v6e
topology: v6e:2x2x1
jax: 0.10.0
libtpu: 0.0.40
codegen_flags: <defaults>
</compile_context>

<pallas_src>
import math
import functools

import jax
import jax.numpy as jnp
from jax.experimental import pallas as pl
from jax.experimental.pallas import tpu as pltpu

_SUBLANE = 8


# ---------------------------------------------------------------------------
# import-time feature detection (no kernel execution, no double compile)
# ---------------------------------------------------------------------------
def _detect_buffered():
    try:
        pl.BlockSpec((8, 128), lambda i: (0, 0), pipeline_mode=pl.Buffered(1))
        return True
    except Exception:
        return False


_HAS_BUFFERED = _detect_buffered()


def _tensorcores_per_chip():
    """Best-effort TC count: megacore chips shard 'parallel' grid axes across
    2 TensorCores; v5e/v6e have a single TC per chip."""
    try:
        kind = jax.devices()[0].device_kind.lower()
    except Exception:
        return 1
    return 2 if any(t in kind for t in ("v7", "v4", "v3")) else 1


def _choose_tm(n_rows, bytes_per_row, n_cores):
    """Row-tile size.

    * Only shard rows across TensorCores when each tile carries meaningful
      MXU work (>= a few thousand rows at these feature dims); otherwise the
      ~0.35us/grid-step overhead + extra weight pushes are pure loss.
    * For large N, size the tile from a VMEM budget (double-buffered x/out
      plus in-body f32 intermediates) instead of an arbitrary row cap.
    """
    split = n_cores > 1 and n_rows >= 4096
    rows_per_core = pl.cdiv(n_rows, n_cores) if split else n_rows
    budget = 24 * 1024 * 1024                      # comfortably < v7x scoped VMEM
    tm_cap = max(_SUBLANE, budget // max(1, bytes_per_row))
    tm = max(_SUBLANE, min(rows_per_core, tm_cap))
    return ((tm + _SUBLANE - 1) // _SUBLANE) * _SUBLANE   # sublane-align


def _vmem_limit_bytes(need_bytes):
    # generous 2x headroom, clamped to v7x's 64 MiB physical VMEM
    return int(min(64 * 1024 * 1024, max(32 * 1024 * 1024, 2 * need_bytes)))


def _const_spec(shape, single_buffer):
    """Constant-index operand: same block every grid step."""
    index_map = lambda i: (0,) * len(shape)
    if single_buffer:
        # no re-DMA / no double-buffer for weights & biases when grid > 1
        return pl.BlockSpec(shape, index_map, pipeline_mode=pl.Buffered(1))
    return pl.BlockSpec(shape, index_map)


# ---------------------------------------------------------------------------
# kernels
# ---------------------------------------------------------------------------
def _layer_kernel(x_ref, w_ref, b_ref, o_ref):
    """One row tile of Layer(x) = x @ W + b."""
    y = jnp.dot(x_ref[...], w_ref[...], preferred_element_type=jnp.float32)
    o_ref[...] = (y + b_ref[...]).astype(o_ref.dtype)


def _mlp_softmax_kernel(x_ref, w1_ref, b1_ref, w2_ref, b2_ref, o_ref):
    """softmax(relu(x @ W1 + b1) @ W2 + b2, axis=1) for one row tile."""
    x = x_ref[...]                                               # (tm, F)
    w1 = w1_ref[...]
    w2 = w2_ref[...]
    h = jnp.dot(x, w1, preferred_element_type=jnp.float32)       # f32 accumulate
    h = jnp.maximum(h + b1_ref[...], 0.0)                        # bias + ReLU
    logits = jnp.dot(h.astype(w2.dtype), w2,
                     preferred_element_type=jnp.float32)
    logits = logits + b2_ref[...]                                # (1, C) bcast
    # numerically-stable softmax over the class axis; exact divide so rows
    # sum to 1 to float precision (approx reciprocal broke that invariant).
    m = jnp.max(logits, axis=1, keepdims=True)
    e = jnp.exp(logits - m)
    denom = jnp.sum(e, axis=1, keepdims=True)
    o_ref[...] = (e / denom).astype(o_ref.dtype)
    # TODO(synk): at real GNN sizes, present a lane-dense output slab (C=16
    # uses 16/128 lanes -> masked stores) and tile K with an f32 accumulator.


# ---------------------------------------------------------------------------
# wrappers (plain jit-able functions, no host sync inside)
# ---------------------------------------------------------------------------
def layer_forward(x, w, b, *, tm=None):
    """Exact equivalent of the PyTorch `Layer.forward`: x @ W + b."""
    N, F = x.shape
    O = w.shape[1]
    b2d = b.reshape(1, O)
    if tm is None:
        tm = _choose_tm(N, 4 * (2 * F + 2 * O), _tensorcores_per_chip())
    num_tiles = pl.cdiv(N, tm)
    single_buffer = _HAS_BUFFERED and num_tiles > 1

    need = 4 * (2 * tm * F + 2 * tm * O + 2 * (F * O + O))
    cost = pl.CostEstimate(flops=2 * N * F * O, transcendentals=0,
                           bytes_accessed=4 * (N * F + F * O + O + N * O))

    return pl.pallas_call(
        _layer_kernel,
        out_shape=jax.ShapeDtypeStruct((N, O), jnp.float32),
        grid_spec=pltpu.PrefetchScalarGridSpec(
            num_scalar_prefetch=0,
            grid=(num_tiles,),
            in_specs=[
                pl.BlockSpec((tm, F), lambda i: (i, 0)),       # x row-tile
                _const_spec((F, O), single_buffer),            # W
                _const_spec((1, O), single_buffer),            # b
            ],
            out_specs=pl.BlockSpec((tm, O), lambda i: (i, 0)),
        ),
        compiler_params=pltpu.CompilerParams(
            dimension_semantics=("parallel",),
            vmem_limit_bytes=_vmem_limit_bytes(need),
        ),
        cost_estimate=cost,
    )(x, w, b2d)


def model_forward(in_feat, adj_mat, w1, b1, w2, b2, *, tm=None,
                  use_bf16_matmul=None):
    """Fused Model.forward: softmax(relu(Layer1(x)) -> Layer2, dim=1)."""
    del adj_mat  # intentionally unused, matches the PyTorch Model.forward
    N, F = in_feat.shape
    H = w1.shape[1]
    C = w2.shape[1]
    b1_2d = b1.reshape(1, H)
    b2_2d = b2.reshape(1, C)

    if tm is None:
        tm = _choose_tm(N, 4 * (2 * F + H + 4 * C), _tensorcores_per_chip())
    num_tiles = pl.cdiv(N, tm)
    single_buffer = _HAS_BUFFERED and num_tiles > 1

    # bf16 MXU inputs (f32 accumulate) only pay off once the matmuls are big
    # enough to matter; keep f32 at toy sizes so results match f32 reference.
    if use_bf16_matmul is None:
        use_bf16_matmul = 2 * N * (F * H + H * C) >= (1 << 28)
    if use_bf16_matmul:
        x_in = in_feat.astype(jnp.bfloat16)
        w1_in = w1.astype(jnp.bfloat16)
        w2_in = w2.astype(jnp.bfloat16)
    else:
        x_in, w1_in, w2_in = in_feat, w1, w2

    itemsize = jnp.dtype(x_in.dtype).itemsize
    need = (2 * tm * F * itemsize + 2 * tm * C * 4 +
            2 * (F * H + H * C) * itemsize + 2 * (H + C) * 4 +
            tm * (H + 3 * C) * 4)
    cost = pl.CostEstimate(
        flops=2 * N * (F * H + H * C),
        transcendentals=N * C,                                   # softmax exp
        bytes_accessed=4 * (N * F + F * H + H + H * C + C + N * C),
    )

    return pl.pallas_call(
        _mlp_softmax_kernel,
        out_shape=jax.ShapeDtypeStruct((N, C), jnp.float32),
        grid_spec=pltpu.PrefetchScalarGridSpec(
            num_scalar_prefetch=0,
            grid=(num_tiles,),
            in_specs=[
                pl.BlockSpec((tm, F), lambda i: (i, 0)),        # x row-tile
                _const_spec((F, H), single_buffer),             # W1
                _const_spec((1, H), single_buffer),             # b1
                _const_spec((H, C), single_buffer),             # W2
                _const_spec((1, C), single_buffer),             # b2
            ],
            # NOTE: out block is (tm, C=16) -> lane-sparse masked stores;
            # acceptable at this size (8 KiB total output).
            out_specs=pl.BlockSpec((tm, C), lambda i: (i, 0)),
        ),
        compiler_params=pltpu.CompilerParams(
            dimension_semantics=("parallel",),
            vmem_limit_bytes=_vmem_limit_bytes(need),
        ),
        cost_estimate=cost,
    )(x_in, w1_in, b1_2d, w2_in, b2_2d)


def _init_layer_params(key, in_feat, out_feat):
    """Mirrors Layer.reset_parameters: uniform(-stdv, stdv), stdv=1/sqrt(out)."""
    stdv = 1.0 / math.sqrt(out_feat)
    kw, kb = jax.random.split(key)
    w = jax.random.uniform(kw, (in_feat, out_feat), jnp.float32, -stdv, stdv)
    b = jax.random.uniform(kb, (1, out_feat), jnp.float32, -stdv, stdv)
    return w, b


if __name__ == "__main__":
    noFeat, noHidden, noClass = 32, 64, 16
    N = 128  # number of graph nodes

    key = jax.random.PRNGKey(0)
    k_x, k_adj, k_l1, k_l2 = jax.random.split(key, 4)

    in_feat = jax.random.normal(k_x, (N, noFeat), jnp.float32)
    adj_mat = jax.random.normal(k_adj, (N, N), jnp.float32)  # unused by forward

    w1, b1 = _init_layer_params(k_l1, noFeat, noHidden)
    w2, b2 = _init_layer_params(k_l2, noHidden, noClass)

    # --- single Layer forward (the spec module): x @ W + b ------------------
    layer_fwd = jax.jit(layer_forward)
    y1 = jax.block_until_ready(layer_fwd(in_feat, w1, b1))
    assert y1.shape == (N, noHidden)
    assert jnp.allclose(y1, in_feat @ w1 + b1, atol=1e-2, rtol=1e-2)

    # --- fused model forward -------------------------------------------------
    model_fwd = jax.jit(model_forward)
    out = jax.block_until_ready(model_fwd(in_feat, adj_mat, w1, b1, w2, b2))

    h_ref = jnp.maximum(in_feat @ w1 + b1, 0.0)
    ref = jax.nn.softmax(h_ref @ w2 + b2, axis=1)
    assert out.shape == (N, noClass)
    assert jnp.allclose(out, ref, atol=1e-3, rtol=1e-3)
    assert jnp.allclose(jnp.sum(out, axis=1), 1.0, atol=1e-3)

    print("KERNEL_OK")
</pallas_src>

<mosaic_0001>
module attributes {stable_mosaic.version = 11 : i64} {
  func.func @_layer_kernel(%arg0: i32, %arg1: memref<128x32xf32, #tpu.memory_space<vmem>>, %arg2: memref<32x64xf32, #tpu.memory_space<vmem>>, %arg3: memref<1x64xf32, #tpu.memory_space<vmem>>, %arg4: memref<128x64xf32, #tpu.memory_space<vmem>>) attributes {dimension_semantics = [#tpu.dimension_semantics<parallel>], iteration_bounds = array<i64: 1>, scalar_prefetch = 0 : i64, scratch_operands = 0 : i64, tpu.core_type = #tpu.core_type<tc>, window_params = [{transform_indices = @transform_0, window_bounds = array<i64: 128, 32>}, {pipeline_mode = #tpu.pipeline_mode<synchronous>, transform_indices = @transform_1, window_bounds = array<i64: 32, 64>}, {pipeline_mode = #tpu.pipeline_mode<synchronous>, transform_indices = @transform_2, window_bounds = array<i64: 1, 64>}, {transform_indices = @transform_3, window_bounds = array<i64: 128, 64>}]} {
    %c0 = arith.constant 0 : index
    %c0_0 = arith.constant 0 : index
    %0 = vector.load %arg1[%c0, %c0_0] : memref<128x32xf32, #tpu.memory_space<vmem>>, vector<128x32xf32>
    %c0_1 = arith.constant 0 : index
    %c0_2 = arith.constant 0 : index
    %1 = vector.load %arg2[%c0_1, %c0_2] : memref<32x64xf32, #tpu.memory_space<vmem>>, vector<32x64xf32>
    %cst = arith.constant dense<0.000000e+00> : vector<128x64xf32>
    %2 = tpu.matmul %0, %1, %cst {dimension_numbers = #tpu.dot_dimension_numbers<[1], [0], [0], [1], [0, 0, 1, 1], [], []>} : vector<128x32xf32>, vector<32x64xf32>, vector<128x64xf32> -> vector<128x64xf32>
    %c0_3 = arith.constant 0 : index
    %c0_4 = arith.constant 0 : index
    %3 = vector.load %arg3[%c0_3, %c0_4] : memref<1x64xf32, #tpu.memory_space<vmem>>, vector<1x64xf32>
    %4 = vector.broadcast %3 : vector<1x64xf32> to vector<128x64xf32>
    %5 = arith.addf %2, %4 : vector<128x64xf32>
    %c0_5 = arith.constant 0 : index
    %c0_6 = arith.constant 0 : index
    %6 = vector.load %arg4[%c0_5, %c0_6] : memref<128x64xf32, #tpu.memory_space<vmem>>, vector<128x64xf32>
    tpu.vector_store %arg4[%c0_5, %c0_6], %5 {strides = array<i32>} : memref<128x64xf32, #tpu.memory_space<vmem>>, vector<128x64xf32>,
    return
  }
  func.func @transform_0(%arg0: i32) -> (i32, i32) {
    %c0_i32 = arith.constant 0 : i32
    %c0_i32_0 = arith.constant 0 : i32
    return %arg0, %c0_i32 : i32, i32
  }
  func.func @transform_1(%arg0: i32) -> (i32, i32) {
    %c0_i32 = arith.constant 0 : i32
    %c0_i32_0 = arith.constant 0 : i32
    %c0_i32_1 = arith.constant 0 : i32
    return %c0_i32, %c0_i32_0 : i32, i32
  }
  func.func @transform_2(%arg0: i32) -> (i32, i32) {
    %c0_i32 = arith.constant 0 : i32
    %c0_i32_0 = arith.constant 0 : i32
    %c0_i32_1 = arith.constant 0 : i32
    return %c0_i32, %c0_i32_0 : i32, i32
  }
  func.func @transform_3(%arg0: i32) -> (i32, i32) {
    %c0_i32 = arith.constant 0 : i32
    %c0_i32_0 = arith.constant 0 : i32
    return %arg0, %c0_i32 : i32, i32
  }
}

</mosaic_0001>

<bundles_post_ra>
// kernel: layer_forward.1
= control target key start
LH: loop header
LB: loop body
LE: loop exit
PB: predicated region body
PF: predicated region fallthrough
CT: control target
= control target key end

     0   :  { %vm41_vm0 = vcmask 261120   ;;  %vm235_vm1 = vcmask 523264   ;;  %s496_s1 = inlined_call_operand.vmem [shape: f32[32,64], index: 1, kind: input, shape index: {}]   ;;  %s497_s0 = inlined_call_operand.vmem [shape: f32[128,32], index: 0, kind: input, shape index: {}]   ;;  %s498_s2 = inlined_call_operand.vmem [shape: f32[1,64], index: 2, kind: input, shape index: {}]   ;;  %s499_s3 = inlined_call_operand.vmem [shape: f32[128,64], index: 3, kind: output, shape index: {}]  }
   0x1   :  { %v33_v0 = vld [vmem:[%s496_s1 + $0x18] sm:$0xff]  ;;  %v32_v1 = vld [vmem:[%s496_s1 + $0x10] sm:$0xff]  ;;  %v31_v2 = vld [vmem:[%s496_s1 + $0x8] sm:$0xff] }
   0x2   :  { %293 = vmatprep.subr.mxu0 %v33_v0  ;;  %325 = vmatprep.subr.mxu1 %v33_v0  ;;  %v30_v3 = vld [vmem:[%s496_s1] sm:$0xff]  ;;  %v15_v6 = vld [vmem:[%s497_s0 + $0x8] sm:$0xff]  ;;  %v16_v8 = vld [vmem:[%s497_s0 + $0x10] sm:$0xff] }
   0x3   :  { %294 = vmatpush3.msra.mxu0 %v33_v0  ;;  %329 = vmatpush3.msra.mxu1 %v33_v0  ;;  %v14_v4 = vld [vmem:[%s497_s0] sm:$0xff]  ;;  %v23_v7 = vld [vmem:[%s497_s0 + $0x48] sm:$0xff]  ;;  %v24_v9 = vld [vmem:[%s497_s0 + $0x50] sm:$0xff] }
   0x4   :  { %295 = vmatprep.subr.mxu0 %v32_v1  ;;  %326 = vmatprep.subr.mxu1 %v32_v1  ;;  %v22_v5 = vld [vmem:[%s497_s0 + $0x40] sm:$0xff]  ;;  %v17_v10 = vld [vmem:[%s497_s0 + $0x18] sm:$0xff]  ;;  %v19_v14 = vld [vmem:[%s497_s0 + $0x28] sm:$0xff] }
   0x5   :  { %296 = vmatpush3.msra.mxu0 %v32_v1  ;;  %330 = vmatpush3.msra.mxu1 %v32_v1  ;;  %v25_v11 = vld [vmem:[%s497_s0 + $0x58] sm:$0xff]  ;;  %v18_v12 = vld [vmem:[%s497_s0 + $0x20] sm:$0xff]  ;;  %v27_v15 = vld [vmem:[%s497_s0 + $0x68] sm:$0xff] }
   0x6   :  { %297 = vmatprep.subr.mxu0 %v31_v2  ;;  %327 = vmatprep.subr.mxu1 %v31_v2  ;;  %v26_v13 = vld [vmem:[%s497_s0 + $0x60] sm:$0xff]  ;;  %v20_v16 = vld [vmem:[%s497_s0 + $0x30] sm:$0xff]  ;;  %v21_v18 = vld [vmem:[%s497_s0 + $0x38] sm:$0xff] }
   0x7   :  { %298 = vmatpush3.msra.mxu0 %v31_v2  ;;  %331 = vmatpush3.msra.mxu1 %v31_v2  ;;  %v28_v17 = vld [vmem:[%s497_s0 + $0x70] sm:$0xff]  ;;  %v29_v19 = vld [vmem:[%s497_s0 + $0x78] sm:$0xff]  ;;  %v256_v20 = vld [vmem:[%s498_s2] ss:$0 sm:$0xff] }
   0x8   :  { %299 = vmatprep.subr.mxu0 %v30_v3  ;;  %328 = vmatprep.subr.mxu1 %v30_v3 }
   0x9   :  { %300 = vmatpush3.msra.mxu0 %v30_v3  ;;  %332 = vmatpush3.msra.mxu1 %v30_v3 }
   0xa   :  { %301 = vmatprep.mubr.msk.f32.mxu0 %vm41_vm0, %v14_v4  ;;  %313 = vmatprep.mubr.msk.f32.mxu1 %vm41_vm0, %v22_v5 }
   0xb   :  { %302 = vmatmul.mubr.msk.f32.vlgmr.msra.gmra.mxu0 %vm41_vm0, %v15_v6  ;;  %314 = vmatmul.mubr.msk.f32.vlgmr.msra.gmra.mxu1 %vm41_vm0, %v23_v7 }
   0xc   :  { %304 = vmatprep.mubr.msk.f32.mxu0 %vm41_vm0, %v16_v8  ;;  %316 = vmatprep.mubr.msk.f32.mxu1 %vm41_vm0, %v24_v9 }
   0xf   :  { %305 = vmatmul.mubr.msk.f32.gmra.mxu0 %vm41_vm0, %v17_v10  ;;  %317 = vmatmul.mubr.msk.f32.gmra.mxu1 %vm41_vm0, %v25_v11 }
  0x10   :  { %307 = vmatprep.mubr.msk.f32.mxu0 %vm41_vm0, %v18_v12  ;;  %319 = vmatprep.mubr.msk.f32.mxu1 %vm41_vm0, %v26_v13 }
  0x13   :  { %308 = vmatmul.mubr.msk.f32.gmra.mxu0 %vm41_vm0, %v19_v14  ;;  %320 = vmatmul.mubr.msk.f32.gmra.mxu1 %vm41_vm0, %v27_v15 }
  0x14   :  { %310 = vmatprep.mubr.msk.f32.mxu0 %vm41_vm0, %v20_v16  ;;  %322 = vmatprep.mubr.msk.f32.mxu1 %vm41_vm0, %v28_v17 }
  0x17   :  { %311 = vmatmul.mubr.msk.f32.gmra.mxu0 %vm41_vm0, %v21_v18  ;;  %323 = vmatmul.mubr.msk.f32.gmra.mxu1 %vm41_vm0, %v29_v19 }
  0xcb   :  { %v303_v21 = vpop.f32.mrf.mxu0  ;;  %v315_v22 = vpop.f32.mrf.mxu1 }
  0xcc   :  { %v162_v23 = vadd.f32 %v303_v21, %v256_v20  ;;  %v202_v24 = vadd.f32 %v315_v22, %v256_v20 }
  0xcd   :  { %v156_v25 = vpop.f32.mrf.mxu0  ;;  %v196_v26 = vpop.f32.mrf.mxu1 }
  0xce   :  { %237 = vst.msk [vmem:[%s499_s3 + $0x8] sm:$0xff] %vm235_vm1, %v162_v23  ;;  %245 = vst.msk [vmem:[%s499_s3 + $0x48] sm:$0xff] %vm235_vm1, %v202_v24  ;;  %v157_v27 = vadd.f32 %v256_v20, %v156_v25  ;;  %v197_v28 = vadd.f32 %v256_v20, %v196_v26 }
  0xcf   :  { %v306_v29 = vpop.f32.mrf.mxu0  ;;  %v318_v30 = vpop.f32.mrf.mxu1 }
  0xd0   :  { %236 = vst.msk [vmem:[%s499_s3] sm:$0xff] %vm235_vm1, %v157_v27  ;;  %244 = vst.msk [vmem:[%s499_s3 + $0x40] sm:$0xff] %vm235_vm1, %v197_v28  ;;  %v172_v31 = vadd.f32 %v306_v29, %v256_v20  ;;  %v212_v32 = vadd.f32 %v318_v30, %v256_v20 }
  0xd1   :  { %v166_v33 = vpop.f32.mrf.mxu0  ;;  %v206_v34 = vpop.f32.mrf.mxu1 }
  0xd2   :  { %239 = vst.msk [vmem:[%s499_s3 + $0x18] sm:$0xff] %vm235_vm1, %v172_v31  ;;  %247 = vst.msk [vmem:[%s499_s3 + $0x58] sm:$0xff] %vm235_vm1, %v212_v32  ;;  %v167_v35 = vadd.f32 %v256_v20, %v166_v33  ;;  %v207_v36 = vadd.f32 %v256_v20, %v206_v34 }
  0xd3   :  { %v309_v37 = vpop.f32.mrf.mxu0  ;;  %v321_v38 = vpop.f32.mrf.mxu1 }
  0xd4   :  { %238 = vst.msk [vmem:[%s499_s3 + $0x10] sm:$0xff] %vm235_vm1, %v167_v35  ;;  %246 = vst.msk [vmem:[%s499_s3 + $0x50] sm:$0xff] %vm235_vm1, %v207_v36  ;;  %v182_v39 = vadd.f32 %v309_v37, %v256_v20  ;;  %v222_v40 = vadd.f32 %v321_v38, %v256_v20 }
  0xd5   :  { %v176_v41 = vpop.f32.mrf.mxu0  ;;  %v216_v42 = vpop.f32.mrf.mxu1 }
  0xd6   :  { %241 = vst.msk [vmem:[%s499_s3 + $0x28] sm:$0xff] %vm235_vm1, %v182_v39  ;;  %249 = vst.msk [vmem:[%s499_s3 + $0x68] sm:$0xff] %vm235_vm1, %v222_v40  ;;  %v177_v43 = vadd.f32 %v256_v20, %v176_v41  ;;  %v217_v44 = vadd.f32 %v256_v20, %v216_v42 }
  0xd7   :  { %v312_v45 = vpop.f32.mrf.mxu0  ;;  %v324_v46 = vpop.f32.mrf.mxu1 }
  0xd8   :  { %240 = vst.msk [vmem:[%s499_s3 + $0x20] sm:$0xff] %vm235_vm1, %v177_v43  ;;  %248 = vst.msk [vmem:[%s499_s3 + $0x60] sm:$0xff] %vm235_vm1, %v217_v44  ;;  %v192_v47 = vadd.f32 %v312_v45, %v256_v20  ;;  %v232_v48 = vadd.f32 %v324_v46, %v256_v20 }
  0xd9   :  { %v186_v49 = vpop.f32.mrf.mxu0  ;;  %v226_v50 = vpop.f32.mrf.mxu1 }
  0xda   :  { %243 = vst.msk [vmem:[%s499_s3 + $0x38] sm:$0xff] %vm235_vm1, %v192_v47  ;;  %251 = vst.msk [vmem:[%s499_s3 + $0x78] sm:$0xff] %vm235_vm1, %v232_v48  ;;  %v187_v51 = vadd.f32 %v256_v20, %v186_v49  ;;  %v227_v52 = vadd.f32 %v256_v20, %v226_v50 }
  0xdc   :  { %242 = vst.msk [vmem:[%s499_s3 + $0x30] sm:$0xff] %vm235_vm1, %v187_v51  ;;  %250 = vst.msk [vmem:[%s499_s3 + $0x70] sm:$0xff] %vm235_vm1, %v227_v52 }

</bundles_post_ra>
